<compile_context>
chip_gen: v6e
topology: v6e:2x2x1
jax: 0.10.0
libtpu: 0.0.40
codegen_flags: <defaults>
</compile_context>

<pallas_src>
import math

import jax
import jax.numpy as jnp
from jax.experimental import pallas as pl
from jax.experimental.pallas import tpu as pltpu

_EPS = 1e-5
_VMEM_LIMIT = 32 * 1024 * 1024  # safe on v5e/v6e/v7x; tiles used here are tiny


# ----------------------------------------------------------------------------
# Kernels
# ----------------------------------------------------------------------------
def _bn1_stats_kernel(xp_ref, w1_ref, b1_ref, sum_ref, sq_ref):
    """Pass 1: per-channel sum / sum-of-squares of h1 = x @ W1 + b1."""
    @pl.when(pl.program_id(0) == 0)
    def _init():
        sum_ref[...] = jnp.zeros_like(sum_ref)
        sq_ref[...] = jnp.zeros_like(sq_ref)

    h = jnp.dot(xp_ref[...], w1_ref[...],
                preferred_element_type=jnp.float32) + b1_ref[...]
    sum_ref[...] += jnp.sum(h, axis=0, keepdims=True)
    sq_ref[...] += jnp.sum(h * h, axis=0, keepdims=True)


def _bn2_stats_kernel(xp_ref, w1_ref, b1_ref, w2_ref, b2_ref, sum_ref, sq_ref):
    """Pass 2: per-channel sum / sumsq of y = relu(x@W1f+b1f) @ W2 + b2."""
    @pl.when(pl.program_id(0) == 0)
    def _init():
        sum_ref[...] = jnp.zeros_like(sum_ref)
        sq_ref[...] = jnp.zeros_like(sq_ref)

    h = jnp.maximum(
        jnp.dot(xp_ref[...], w1_ref[...],
                preferred_element_type=jnp.float32) + b1_ref[...], 0.0)
    y = jnp.dot(h, w2_ref[...], preferred_element_type=jnp.float32) + b2_ref[...]
    sum_ref[...] += jnp.sum(y, axis=0, keepdims=True)
    sq_ref[...] += jnp.sum(y * y, axis=0, keepdims=True)


def _output_kernel(xp_ref, w1_ref, b1_ref, w2_ref, b2_ref, o_ref):
    """Pass 3: fully folded conv1 -> relu -> conv2 (both BNs folded into W/b)."""
    h = jnp.maximum(
        jnp.dot(xp_ref[...], w1_ref[...],
                preferred_element_type=jnp.float32) + b1_ref[...], 0.0)
    o_ref[...] = (jnp.dot(h, w2_ref[...],
                          preferred_element_type=jnp.float32)
                  + b2_ref[...]).astype(o_ref.dtype)


# ----------------------------------------------------------------------------
# Host-side helpers
# ----------------------------------------------------------------------------
def _block_diag(w, p):
    """(In, Out) -> (p*In, p*Out) block-diagonal with p copies of w."""
    if p == 1:
        return w
    inn, out = w.shape
    eye = jnp.eye(p, dtype=w.dtype)
    return jnp.einsum("pq,io->piqo", eye, w).reshape(p * inn, p * out)


def _tile_bias(b, p):
    """(C,) -> (1, p*C) with the bias repeated once per packed row group."""
    return jnp.tile(b.reshape(1, -1), (1, p))


def _params(parallel):
    return pltpu.CompilerParams(
        dimension_semantics=("parallel",) if parallel else ("arbitrary",),
        vmem_limit_bytes=_VMEM_LIMIT)


# ----------------------------------------------------------------------------
# Forward wrapper
# ----------------------------------------------------------------------------
def local_embedding_forward(x, w1, b1, gamma1, beta1, w2, b2, *, tile_rows=2048):
    """x: (B, L, input_dim) f32 -> (B, L, output_dim) f32 (training-mode BN)."""
    f32 = jnp.float32
    B, L, Cin = x.shape
    H = w1.shape[0]
    O = w2.shape[0]
    M = B * L

    # Lane-packing factor: P rows share one vector row so the packed output
    # width P*O is a multiple of 128 (unmasked lane-dense stores).  Fall back
    # to P=1 (correct, just lane-sparse) if packed weights would be large.
    P = 128 // math.gcd(128, O)
    if P * max(Cin, H, O) > 2048:
        P = 1

    tm_unit = 8 * P                               # keep (8,128) sublane rule
    tm = max(tm_unit, (int(tile_rows) // tm_unit) * tm_unit)
    tm = min(tm, ((M + tm_unit - 1) // tm_unit) * tm_unit)
    m_pad = ((M + tm - 1) // tm) * tm
    n_pad = m_pad - M
    nt = m_pad // tm
    tmp = tm // P                                 # packed rows per tile

    x2d = x.reshape(M, Cin).astype(f32)
    if n_pad:
        x2d = jnp.pad(x2d, ((0, n_pad), (0, 0)))  # zero rows; corrected below
    xp = x2d.reshape(m_pad // P, P * Cin)         # free row-major view

    w1 = w1.astype(f32); b1 = b1.astype(f32)
    gamma1 = gamma1.astype(f32); beta1 = beta1.astype(f32)
    w2 = w2.astype(f32); b2 = b2.astype(f32)
    w1t = w1.T                                    # (Cin, H)
    w2t = w2.T                                    # (H, O)

    x_spec = pl.BlockSpec((tmp, P * Cin), lambda i: (i, 0))

    def const_spec(shape):
        return pl.BlockSpec(shape, lambda i: (0, 0))

    # ---------------- pass 1: BN1 batch statistics --------------------------
    w1_blk = _block_diag(w1t, P)                  # (P*Cin, P*H)
    b1_til = _tile_bias(b1, P)                    # (1, P*H)
    s1, q1 = pl.pallas_call(
        _bn1_stats_kernel,
        out_shape=(jax.ShapeDtypeStruct((1, P * H), f32),
                   jax.ShapeDtypeStruct((1, P * H), f32)),
        grid=(nt,),
        in_specs=[x_spec, const_spec(w1_blk.shape), const_spec(b1_til.shape)],
        out_specs=(const_spec((1, P * H)), const_spec((1, P * H))),
        compiler_params=_params(parallel=False),
    )(xp, w1_blk, b1_til)

    # zero-pad rows each contributed exactly b1 / b1^2 per channel
    sum1 = s1.reshape(P, H).sum(axis=0) - n_pad * b1
    sq1 = q1.reshape(P, H).sum(axis=0) - n_pad * (b1 * b1)
    mu1 = sum1 / M
    var1 = jnp.maximum(sq1 / M - mu1 * mu1, 0.0)  # biased batch variance
    scale1 = gamma1 * jax.lax.rsqrt(var1 + _EPS)
    w1f = w1t * scale1[None, :]                   # BN1 folded into conv1
    b1f = (b1 - mu1) * scale1 + beta1

    # ---------------- pass 2: BN2 batch statistics --------------------------
    w1f_blk = _block_diag(w1f, P)
    b1f_til = _tile_bias(b1f, P)
    w2_blk = _block_diag(w2t, P)
    b2_til = _tile_bias(b2, P)
    s2, q2 = pl.pallas_call(
        _bn2_stats_kernel,
        out_shape=(jax.ShapeDtypeStruct((1, P * O), f32),
                   jax.ShapeDtypeStruct((1, P * O), f32)),
        grid=(nt,),
        in_specs=[x_spec,
                  const_spec(w1f_blk.shape), const_spec(b1f_til.shape),
                  const_spec(w2_blk.shape), const_spec(b2_til.shape)],
        out_specs=(const_spec((1, P * O)), const_spec((1, P * O))),
        compiler_params=_params(parallel=False),
    )(xp, w1f_blk, b1f_til, w2_blk, b2_til)

    # zero-pad rows contributed the constant y_pad = relu(b1f) @ W2 + b2
    y_pad = jnp.maximum(b1f, 0.0) @ w2t + b2
    sum2 = s2.reshape(P, O).sum(axis=0) - n_pad * y_pad
    sq2 = q2.reshape(P, O).sum(axis=0) - n_pad * (y_pad * y_pad)
    mu2 = sum2 / M
    var2 = jnp.maximum(sq2 / M - mu2 * mu2, 0.0)
    inv2 = jax.lax.rsqrt(var2 + _EPS)
    w2f = w2t * inv2[None, :]                     # BN2 folded into conv2
    b2f = (b2 - mu2) * inv2

    # ---------------- pass 3: folded forward, lane-dense output write -------
    w2f_blk = _block_diag(w2f, P)
    b2f_til = _tile_bias(b2f, P)
    out_p = pl.pallas_call(
        _output_kernel,
        out_shape=jax.ShapeDtypeStruct((m_pad // P, P * O), f32),
        grid=(nt,),
        in_specs=[x_spec,
                  const_spec(w1f_blk.shape), const_spec(b1f_til.shape),
                  const_spec(w2f_blk.shape), const_spec(b2f_til.shape)],
        out_specs=pl.BlockSpec((tmp, P * O), lambda i: (i, 0)),
        compiler_params=_params(parallel=True),   # v7x: split over both TCs
    )(xp, w1f_blk, b1f_til, w2f_blk, b2f_til)

    out2d = out_p.reshape(m_pad, O)[:M]           # free view + drop pad rows
    return out2d.reshape(B, L, O)


# ----------------------------------------------------------------------------
# Pure-JAX reference (training-mode PyTorch semantics)
# ----------------------------------------------------------------------------
def _reference_forward(x, w1, b1, gamma1, beta1, w2, b2):
    eps = 1e-5
    h = jnp.einsum("blc,hc->blh", x, w1) + b1
    mu = h.mean(axis=(0, 1)); var = ((h - mu) ** 2).mean(axis=(0, 1))
    h = (h - mu) / jnp.sqrt(var + eps) * gamma1 + beta1
    h = jnp.maximum(h, 0.0)
    y = jnp.einsum("blh,oh->blo", h, w2) + b2
    mu2 = y.mean(axis=(0, 1)); var2 = ((y - mu2) ** 2).mean(axis=(0, 1))
    return (y - mu2) / jnp.sqrt(var2 + eps)


if __name__ == "__main__":
    B, L = 2, 16
    input_dim, hidden_dim, output_dim = 8, 32, 16

    key = jax.random.PRNGKey(0)
    kx, kw1, kb1, kg1, kbe1, kw2, kb2 = jax.random.split(key, 7)

    x = jax.random.normal(kx, (B, L, input_dim), dtype=jnp.float32)
    # Conv1d weights (out, in, k=1) squeezed to (out, in); BN1 affine params.
    w1 = jax.random.normal(kw1, (hidden_dim, input_dim), dtype=jnp.float32) * 0.1
    b1 = jax.random.normal(kb1, (hidden_dim,), dtype=jnp.float32) * 0.1
    gamma1 = 1.0 + 0.1 * jax.random.normal(kg1, (hidden_dim,), dtype=jnp.float32)
    beta1 = 0.1 * jax.random.normal(kbe1, (hidden_dim,), dtype=jnp.float32)
    w2 = jax.random.normal(kw2, (output_dim, hidden_dim), dtype=jnp.float32) * 0.1
    b2 = jax.random.normal(kb2, (output_dim,), dtype=jnp.float32) * 0.1

    out = local_embedding_forward(x, w1, b1, gamma1, beta1, w2, b2)
    out = jax.block_until_ready(out)

    ref = _reference_forward(x, w1, b1, gamma1, beta1, w2, b2)
    assert out.shape == (B, L, output_dim)
    err = float(jnp.max(jnp.abs(out - ref)))
    assert jnp.allclose(out, ref, atol=1e-3, rtol=1e-3), err

    print("KERNEL_OK")
</pallas_src>

<mosaic_0001>
module attributes {stable_mosaic.version = 11 : i64} {
  func.func @_bn1_stats_kernel(%arg0: i32, %arg1: memref<8x64xf32, #tpu.memory_space<vmem>>, %arg2: memref<64x256xf32, #tpu.memory_space<vmem>>, %arg3: memref<1x256xf32, #tpu.memory_space<vmem>>, %arg4: memref<1x256xf32, #tpu.memory_space<vmem>>, %arg5: memref<1x256xf32, #tpu.memory_space<vmem>>) attributes {dimension_semantics = [#tpu.dimension_semantics<arbitrary>], iteration_bounds = array<i64: 1>, scalar_prefetch = 0 : i64, scratch_operands = 0 : i64, tpu.core_type = #tpu.core_type<tc>, window_params = [{transform_indices = @transform_0, window_bounds = array<i64: 8, 64>}, {pipeline_mode = #tpu.pipeline_mode<synchronous>, transform_indices = @transform_1, window_bounds = array<i64: 64, 256>}, {pipeline_mode = #tpu.pipeline_mode<synchronous>, transform_indices = @transform_2, window_bounds = array<i64: 1, 256>}, {pipeline_mode = #tpu.pipeline_mode<synchronous>, transform_indices = @transform_3, window_bounds = array<i64: 1, 256>}, {pipeline_mode = #tpu.pipeline_mode<synchronous>, transform_indices = @transform_4, window_bounds = array<i64: 1, 256>}]} {
    %c0_i32 = arith.constant 0 : i32
    %0 = arith.cmpi eq, %arg0, %c0_i32 : i32
    %1 = arith.extui %0 : i1 to i32
    %c0_i32_0 = arith.constant 0 : i32
    %2 = arith.cmpi ne, %1, %c0_i32_0 : i32
    scf.if %2 {
      %cst_16 = arith.constant 0.000000e+00 : f32
      %20 = vector.broadcast %cst_16 : f32 to vector<1x256xf32>
      %c0_17 = arith.constant 0 : index
      %c0_18 = arith.constant 0 : index
      %21 = vector.load %arg4[%c0_17, %c0_18] : memref<1x256xf32, #tpu.memory_space<vmem>>, vector<1x256xf32>
      tpu.vector_store %arg4[%c0_17, %c0_18], %20 {strides = array<i32>} : memref<1x256xf32, #tpu.memory_space<vmem>>, vector<1x256xf32>,
      %cst_19 = arith.constant 0.000000e+00 : f32
      %22 = vector.broadcast %cst_19 : f32 to vector<1x256xf32>
      %c0_20 = arith.constant 0 : index
      %c0_21 = arith.constant 0 : index
      %23 = vector.load %arg5[%c0_20, %c0_21] : memref<1x256xf32, #tpu.memory_space<vmem>>, vector<1x256xf32>
      tpu.vector_store %arg5[%c0_20, %c0_21], %22 {strides = array<i32>} : memref<1x256xf32, #tpu.memory_space<vmem>>, vector<1x256xf32>,
    } else {
    }
    %c0 = arith.constant 0 : index
    %c0_1 = arith.constant 0 : index
    %3 = vector.load %arg1[%c0, %c0_1] : memref<8x64xf32, #tpu.memory_space<vmem>>, vector<8x64xf32>
    %c0_2 = arith.constant 0 : index
    %c0_3 = arith.constant 0 : index
    %4 = vector.load %arg2[%c0_2, %c0_3] : memref<64x256xf32, #tpu.memory_space<vmem>>, vector<64x256xf32>
    %cst = arith.constant dense<0.000000e+00> : vector<8x256xf32>
    %5 = tpu.matmul %3, %4, %cst {dimension_numbers = #tpu.dot_dimension_numbers<[1], [0], [0], [1], [0, 0, 1, 1], [], []>} : vector<8x64xf32>, vector<64x256xf32>, vector<8x256xf32> -> vector<8x256xf32>
    %c0_4 = arith.constant 0 : index
    %c0_5 = arith.constant 0 : index
    %6 = vector.load %arg3[%c0_4, %c0_5] : memref<1x256xf32, #tpu.memory_space<vmem>>, vector<1x256xf32>
    %7 = vector.broadcast %6 : vector<1x256xf32> to vector<8x256xf32>
    %8 = arith.addf %5, %7 : vector<8x256xf32>
    %c0_6 = arith.constant 0 : index
    %c0_7 = arith.constant 0 : index
    %9 = vector.load %arg4[%c0_6, %c0_7] : memref<1x256xf32, #tpu.memory_space<vmem>>, vector<1x256xf32>
    %cst_8 = arith.constant dense<0.000000e+00> : vector<256xf32>
    %10 = vector.multi_reduction <add>, %8, %cst_8 [0] : vector<8x256xf32> to vector<256xf32>
    %11 = vector.shape_cast %10 : vector<256xf32> to vector<1x256xf32>
    %12 = arith.addf %9, %11 : vector<1x256xf32>
    %c0_9 = arith.constant 0 : index
    %c0_10 = arith.constant 0 : index
    %13 = vector.load %arg4[%c0_9, %c0_10] : memref<1x256xf32, #tpu.memory_space<vmem>>, vector<1x256xf32>
    tpu.vector_store %arg4[%c0_9, %c0_10], %12 {strides = array<i32>} : memref<1x256xf32, #tpu.memory_space<vmem>>, vector<1x256xf32>,
    %c0_11 = arith.constant 0 : index
    %c0_12 = arith.constant 0 : index
    %14 = vector.load %arg5[%c0_11, %c0_12] : memref<1x256xf32, #tpu.memory_space<vmem>>, vector<1x256xf32>
    %15 = arith.mulf %8, %8 : vector<8x256xf32>
    %cst_13 = arith.constant dense<0.000000e+00> : vector<256xf32>
    %16 = vector.multi_reduction <add>, %15, %cst_13 [0] : vector<8x256xf32> to vector<256xf32>
    %17 = vector.shape_cast %16 : vector<256xf32> to vector<1x256xf32>
    %18 = arith.addf %14, %17 : vector<1x256xf32>
    %c0_14 = arith.constant 0 : index
    %c0_15 = arith.constant 0 : index
    %19 = vector.load %arg5[%c0_14, %c0_15] : memref<1x256xf32, #tpu.memory_space<vmem>>, vector<1x256xf32>
    tpu.vector_store %arg5[%c0_14, %c0_15], %18 {strides = array<i32>} : memref<1x256xf32, #tpu.memory_space<vmem>>, vector<1x256xf32>,
    return
  }
  func.func @transform_0(%arg0: i32) -> (i32, i32) {
    %c0_i32 = arith.constant 0 : i32
    %c0_i32_0 = arith.constant 0 : i32
    return %arg0, %c0_i32 : i32, i32
  }
  func.func @transform_1(%arg0: i32) -> (i32, i32) {
    %c0_i32 = arith.constant 0 : i32
    %c0_i32_0 = arith.constant 0 : i32
    %c0_i32_1 = arith.constant 0 : i32
    return %c0_i32, %c0_i32_0 : i32, i32
  }
  func.func @transform_2(%arg0: i32) -> (i32, i32) {
    %c0_i32 = arith.constant 0 : i32
    %c0_i32_0 = arith.constant 0 : i32
    %c0_i32_1 = arith.constant 0 : i32
    return %c0_i32, %c0_i32_0 : i32, i32
  }
  func.func @transform_3(%arg0: i32) -> (i32, i32) {
    %c0_i32 = arith.constant 0 : i32
    %c0_i32_0 = arith.constant 0 : i32
    %c0_i32_1 = arith.constant 0 : i32
    return %c0_i32, %c0_i32_0 : i32, i32
  }
  func.func @transform_4(%arg0: i32) -> (i32, i32) {
    %c0_i32 = arith.constant 0 : i32
    %c0_i32_0 = arith.constant 0 : i32
    %c0_i32_1 = arith.constant 0 : i32
    return %c0_i32, %c0_i32_0 : i32, i32
  }
}

</mosaic_0001>

<bundles_post_ra>
// kernel: tpu_custom_call.1
= control target key start
LH: loop header
LB: loop body
LE: loop exit
PB: predicated region body
PF: predicated region fallthrough
CT: control target
= control target key end

     0   :  { %10 = vsyncpa [#allocation3], 0  ;;  %s417_s0 = inlined_call_operand.hbm [shape: f32[8,64], index: 0, kind: input, shape index: {}]   ;;  %s418_s1 = inlined_call_operand.hbm [shape: f32[64,256], index: 1, kind: input, shape index: {}]   ;;  %s419_s2 = inlined_call_operand.vmem [shape: f32[1,256], index: 2, kind: input, shape index: {}]   ;;  %s420_s3 = inlined_call_operand.hbm [shape: f32[1,256], index: 3, kind: output, shape index: {0}]   ;;  %s421_s4 = inlined_call_operand.hbm [shape: f32[1,256], index: 4, kind: output, shape index: {1}]  }
   0x1   :  { %11 = vsyncpa [#allocation6], 0 }
   0x2   :  { %12 = vsyncpa [#allocation4], 0 }
   0x3   :  { %13 = vsyncpa [#allocation9], 0  ;;  %s357_s15 = smov [#allocation2]   ;;  %s358_s17 = smov [#allocation5]  }
   0x4   :  { %s20_s16 = sshll.u32 %s357_s15, 4  ;;  %s29_s18 = sshll.u32 %s358_s17, 4  ;;  %s21_s16 = int_to_ptr.vmem [resolvable:$true] %s20_s16  ;;  %s30_s18 = int_to_ptr.vmem [resolvable:$true] %s29_s18 }
   0x5   :  { %s277_s19 = scalar_lea.vmem %s21_s16, 128  ;;  %p282_p1 = scmp.lt.s32.totalorder %s21_s16, %s21_s16 }
   0x6   :  { %p278_p0 = scmp.ne.s32.totalorder %s21_s16, %s277_s19  ;;  %p283_p2 = scmp.lt.s32.totalorder %s277_s19, %s277_s19 }
   0x8   :  { %p284_p3 = por %p283_p2, %p282_p1 }
   0xa   :  { %p285_p4 = pnand %p284_p3, %p278_p0 }
   0xc   :  { %288 = shalt.err (!%p285_p4)
}
   0xd   :  { %23 = dma.hbm_to_vmem [thread:$0]  %s417_s0, 128, %s21_s16, [#allocation3]  }
   0xe   :  { %s297_s22 = scalar_lea.vmem %s30_s18, 2048  ;;  %p302_p6 = scmp.lt.s32.totalorder %s30_s18, %s30_s18 }
   0xf   :  { %p298_p5 = scmp.ne.s32.totalorder %s30_s18, %s297_s22  ;;  %p303_p7 = scmp.lt.s32.totalorder %s297_s22, %s297_s22 }
  0x11   :  { %p304_p8 = por %p303_p7, %p302_p6 }
  0x13   :  { %p305_p9 = pnand %p304_p8, %p298_p5 }
  0x15   :  { %308 = shalt.err (!%p305_p9)
}
  0x16   :  { %s359_s23 = smov 256   ;;  %s360_s24 = smov 16  }
  0x17   :  { %35 = dma.hbm_to_vmem [thread:$0]  %s418_s1, 2048, %s30_s18, [#allocation6], %s359_s23, %s359_s23, %s360_s24  }
  0x18   :  { %349 = dma.done.wait [#allocation3], 128  }
  0x19   :  { %350 = vsyncadd [#allocation3], 4294967168 }
  0x1a   :  { %351 = dma.done.wait [#allocation6], 2048  }
  0x1b   :  { %352 = vsyncadd [#allocation6], 4294965248  ;;  %v48_v0 = vlaneseq  ;;  %v361_v1 = vmov 0.0   ;;  %v70_v3 = vld [vmem:[#allocation5 + $0x78] sm:$0xff]  ;;  %v69_v4 = vld [vmem:[#allocation5 + $0x70] sm:$0xff]  ;;  %vm83_vm1 = vcmask 523264  }
  0x1c   :  { %151 = vmatprep.mubr.f32.mxu0 %v361_v1  ;;  %v68_v5 = vld [vmem:[#allocation5 + $0x68] sm:$0xff]  ;;  %103 = vmatprep.subr.mxu0 %v70_v3  ;;  %v67_v6 = vld [vmem:[#allocation5 + $0x60] sm:$0xff]  ;;  %v66_v7 = vld [vmem:[#allocation5 + $0x58] sm:$0xff]  ;;  %v362_v36 = vmov 1966171168   ;;  %s364_s28 = smov [#allocation8]  }
  0x1d   :  { %vm396_vm0 = vcmp.lt.s32.totalorder %v48_v0, 256  ;;  %104 = vmatpush1.msra.mxu0 %v69_v4  ;;  %v65_v8 = vld [vmem:[#allocation5 + $0x50] sm:$0xff]  ;;  %v64_v9 = vld [vmem:[#allocation5 + $0x48] sm:$0xff]  ;;  %v63_v10 = vld [vmem:[#allocation5 + $0x40] sm:$0xff]  ;;  %v74_v20 = vshrl.u32 %v48_v0, 7  ;;  %v175_v37 = vunpack.c.l.s4 %v362_v36  ;;  %s246_s29 = sshll.u32 %s364_s28, 4  ;;  %s247_s29 = int_to_ptr.vmem [resolvable:$true] %s246_s29 }
  0x1e   :  { %52 = vst.msk [vmem:[#allocation7] sm:$0x3] %vm396_vm0, %v361_v1  ;;  %53 = vst.msk [vmem:[#allocation8] sm:$0x3] %vm396_vm0, %v361_v1  ;;  %105 = vmatprep.subr.mxu0 %v68_v5  ;;  %v62_v11 = vld [vmem:[#allocation5 + $0x38] sm:$0xff]  ;;  %v61_v12 = vld [vmem:[#allocation5 + $0x30] sm:$0xff] }
  0x1f   :  { %106 = vmatpush1.msra.mxu0 %v67_v6  ;;  %v60_v13 = vld [vmem:[#allocation5 + $0x28] sm:$0xff]  ;;  %v59_v14 = vld [vmem:[#allocation5 + $0x20] sm:$0xff]  ;;  %v58_v15 = vld [vmem:[#allocation5 + $0x18] sm:$0xff]  ;;  %v75_v21 = vsub.s32 0, %v74_v20  ;;  %v79_v23 = vsub.s32 1, %v74_v20  ;;  %v176_v46 = vunpack.c.0.s8 %v175_v37 }
  0x20   :  { %107 = vmatprep.subr.mxu0 %v66_v7  ;;  %v57_v16 = vld [vmem:[#allocation5 + $0x10] sm:$0xff]  ;;  %v56_v17 = vld [vmem:[#allocation5 + $0x8] sm:$0xff]  ;;  %v55_v18 = vld [vmem:[#allocation5] sm:$0xff] }
  0x21   :  { %108 = vmatpush1.msra.mxu0 %v65_v8  ;;  %v54_v19 = vld [vmem:[#allocation2] sm:$0xff]  ;;  %v179_v55 = vsub.s32 %v176_v46, %v74_v20 }
  0x22   :  { %109 = vmatprep.subr.mxu0 %v64_v9  ;;  %v71_v22 = vld [vmem:[%s419_s2] sm:$0x3]  ;;  %s363_s2 = smov [#allocation7]  }
  0x23   :  { %110 = vmatpush1.msra.mxu0 %v63_v10  ;;  %v76_v24 = vrot.slane %v71_v22, %v75_v21  ;;  %v80_v25 = vrot.slane %v71_v22, %v79_v23  ;;  %s236_s27 = sshll.u32 %s363_s2, 4  ;;  %s237_s27 = int_to_ptr.vmem [resolvable:$true] %s236_s27 }
  0x24   :  { %111 = vmatprep.subr.mxu0 %v62_v11  ;;  %s309_s30 = scalar_lea.vmem %s237_s27, 32  ;;  %p314_p11 = scmp.lt.s32.totalorder %s237_s27, %s237_s27 }
  0x25   :  { %112 = vmatpush1.msra.mxu0 %v61_v12  ;;  %v158_v63 = vld [vmem:[#allocation7] sm:$0x3]  ;;  %v195_v3 = vld [vmem:[#allocation8] sm:$0x3]  ;;  %p310_p10 = scmp.ne.s32.totalorder %s237_s27, %s309_s30  ;;  %p315_p12 = scmp.lt.s32.totalorder %s309_s30, %s309_s30 }
  0x26   :  { %113 = vmatprep.subr.mxu0 %v60_v13 }
  0x27   :  { %114 = vmatpush1.msra.mxu0 %v59_v14  ;;  %p316_p13 = por %p315_p12, %p314_p11 }
  0x28   :  { %115 = vmatprep.subr.mxu0 %v58_v15 }
  0x29   :  { %116 = vmatpush1.msra.mxu0 %v57_v16  ;;  %p317_p0 = pnand %p316_p13, %p310_p10 }
  0x2a   :  { %117 = vmatprep.subr.mxu0 %v56_v17 }
  0x2b   :  { %118 = vmatpush1.msra.mxu0 %v55_v18 }
  0x2c   :  { %260 = vmatmul.mubr.msk.f32.vlgmr.msra.gmra.mxu0 %vm83_vm1, %v54_v19 }
  0xec   :  { %v153_v26 = vpop.f32.mrf.mxu0 }
  0xed   :  { %v154_v27 = vadd.f32 %v153_v26, %v76_v24 }
  0xee   :  { %v155_v28 = vpop.f32.mrf.mxu0 }
  0xef   :  { %v159_v29 = vrot.slane %v154_v27, 4  ;;  %v196_v30 = vmul.f32 %v154_v27, %v154_v27  ;;  %v156_v31 = vadd.f32 %v155_v28, %v80_v25 }
  0xf1   :  { %v160_v32 = vadd.f32 %v159_v29, %v154_v27  ;;  %v198_v33 = vrot.slane %v196_v30, 4  ;;  %v165_v34 = vrot.slane %v156_v31, 4  ;;  %v197_v35 = vmul.f32 %v156_v31, %v156_v31 }
  0xf3   :  { %v161_v38 = vrot.slane %v160_v32, 2  ;;  %v199_v39 = vadd.f32 %v198_v33, %v196_v30  ;;  %v166_v40 = vadd.f32 %v165_v34, %v156_v31  ;;  %v204_v41 = vrot.slane %v197_v35, 4 }
  0xf5   :  { %v162_v42 = vadd.f32 %v161_v38, %v160_v32  ;;  %v200_v43 = vrot.slane %v199_v39, 2  ;;  %v167_v44 = vrot.slane %v166_v40, 2  ;;  %v205_v45 = vadd.f32 %v204_v41, %v197_v35 }
  0xf7   :  { %v163_v47 = vrot.slane %v162_v42, 1  ;;  %v201_v48 = vadd.f32 %v200_v43, %v199_v39  ;;  %v168_v49 = vadd.f32 %v167_v44, %v166_v40  ;;  %v206_v50 = vrot.slane %v205_v45, 2 }
  0xf9   :  { %v202_v51 = vrot.slane %v201_v48, 1  ;;  %v169_v52 = vrot.slane %v168_v49, 1  ;;  %v207_v53 = vadd.f32 %v206_v50, %v205_v45  ;;  %v164_v54 = vadd.f32 %v163_v47, %v162_v42 }
  0xfb   :  { %v170_v56 = vadd.f32 %v169_v52, %v168_v49  ;;  %v208_v57 = vrot.slane %v207_v53, 1  ;;  %v203_v58 = vadd.f32 %v202_v51, %v201_v48 }
  0xfd   :  { %v173_v59 = vcombine.low %v164_v54, %v170_v56  ;;  %v209_v60 = vadd.f32 %v208_v57, %v207_v53 }
  0xff   :  { %v212_v61 = vcombine.low %v203_v58, %v209_v60  ;;  %v180_v62 = vrot.slane %v173_v59, %v179_v55 }
 0x101   :  { %v187_v0 = vrot.slane %v180_v62, %v179_v55  ;;  %v219_v1 = vrot.slane %v212_v61, %v179_v55 }
 0x103   :  { %v189_v4 = vadd.f32 %v187_v0, %v158_v63  ;;  %v226_v5 = vrot.slane %v219_v1, %v179_v55 }
 0x105   :  { %194 = vst.msk [vmem:[#allocation7] sm:$0x3] %vm396_vm0, %v189_v4  ;;  %v228_v6 = vadd.f32 %v226_v5, %v195_v3 }
 0x106   :  { %320 = shalt.err (!%p317_p0)
}
 0x107   :  { %239 = dma.vmem_to_hbm [thread:$0]  %s237_s27, 32, %s420_s3, [#allocation4]   ;;  %229 = vst.msk [vmem:[#allocation8] sm:$0x3] %vm396_vm0, %v228_v6 }
 0x108   :  { %s329_s7 = scalar_lea.vmem %s247_s29, 32  ;;  %p334_p2 = scmp.lt.s32.totalorder %s247_s29, %s247_s29 }
 0x109   :  { %p330_p1 = scmp.ne.s32.totalorder %s247_s29, %s329_s7  ;;  %p335_p3 = scmp.lt.s32.totalorder %s329_s7, %s329_s7 }
 0x10b   :  { %p336_p4 = por %p335_p3, %p334_p2 }
 0x10d   :  { %p337_p5 = pnand %p336_p4, %p330_p1 }
 0x10f   :  { %340 = shalt.err (!%p337_p5)
}
 0x110   :  { %249 = dma.vmem_to_hbm [thread:$0]  %s247_s29, 32, %s421_s4, [#allocation9]  }
 0x111   :  { %353 = dma.done.wait [#allocation4], 32  }
 0x112   :  { %354 = vsyncadd [#allocation4], 4294967264 }
 0x113   :  { %355 = dma.done.wait [#allocation9], 32  }
 0x114   :  { %356 = vsyncadd [#allocation9], 4294967264 }
 0x115   :  { %256 = vsyncpa [#allocation3], 1 }
 0x116   :  { %257 = vsyncpa [#allocation6], 1 }
 0x117   :  { %258 = vsyncpa [#allocation4], 1 }
 0x118   :  { %259 = vsyncpa [#allocation9], 1 }

</bundles_post_ra>
